<compile_context>
chip_gen: v5e
topology: v5e:2x2
jax: 0.10.0
libtpu: 0.0.40
codegen_flags: <defaults>
</compile_context>

<pallas_src>
import jax
import jax.numpy as jnp
from jax.experimental import pallas as pl
from jax.experimental.pallas import tpu as pltpu

LANE = 128                  # TPU vreg lane width
MAX_TILE_B = 128 * 1024     # 131072 lanes/tile: ~4.7 MB of x per step (f32);
                            # 3x-buffered working set ~12.5 MiB -> fits VMEM on
                            # v5e/v6e (128 MiB) and v7x (64 MiB) with margin.
VMEM_LIMIT_BYTES = 32 * 1024 * 1024   # explicit (v5e scoped default is 16 MiB)


def _round_up(n, m):
    return ((n + m - 1) // m) * m


def _choose_tile(batch):
    """Pick a lane-dense batch tile and the 1-D grid length."""
    if batch <= LANE:
        # Tiny batch: a single full-array block (full dims are exempt from the
        # 128-lane divisibility rule). Perf is irrelevant at this size.
        return batch, 1
    b_lanes = _round_up(batch, LANE)
    # Keep >= 2 grid steps when possible so the "parallel" batch axis can be
    # split across v7x's two TensorCores.
    tb = min(MAX_TILE_B, _round_up(pl.cdiv(b_lanes, 2), LANE))
    grid = pl.cdiv(batch, tb)
    return tb, grid


def _mlp_kernel(w1_ref, b1_ref, w2_ref, b2_ref, w3_ref, b3_ref, x_ref, o_ref):
    """Feature-major MLP on one lane-dense batch tile.

    x_ref: (7, TB)   o_ref: (2, TB)
    w/b refs: tiny resident full-array VMEM blocks (no per-step slicing).
    """
    x = x_ref[...].astype(jnp.float32)                                   # (7, TB)
    h1 = jnp.dot(w1_ref[...], x, preferred_element_type=jnp.float32)     # (4, TB)
    h1 = jnp.maximum(h1 + b1_ref[...], 0.0)
    h2 = jnp.dot(w2_ref[...], h1, preferred_element_type=jnp.float32)    # (2, TB)
    h2 = jnp.maximum(h2 + b2_ref[...], 0.0)
    out = jnp.dot(w3_ref[...], h2, preferred_element_type=jnp.float32)   # (2, TB)
    o_ref[...] = (out + b3_ref[...]).astype(o_ref.dtype)


def net_7_2_forward_feature_major(x_t, params, *, block_b=None):
    """x_t: (7, B) feature-major activations (batch on the lane axis).
    Returns (2, B) feature-major output. No transpose/pad passes over HBM."""
    assert x_t.shape[0] == 7, x_t.shape
    B = x_t.shape[1]

    if B <= LANE:
        tb, grid = B, 1
    elif block_b is not None:
        tb = min(_round_up(block_b, LANE), _round_up(B, LANE))
        grid = pl.cdiv(B, tb)
    else:
        tb, grid = _choose_tile(B)

    # Params as individual tiny resident VMEM refs: constant index_map =>
    # fetched once (block index never changes), zero per-step slicing/relayout.
    w1 = params["w1"].astype(jnp.float32)                     # (4, 7)
    b1 = params["b1"].reshape(4, 1).astype(jnp.float32)
    w2 = params["w2"].astype(jnp.float32)                     # (2, 4)
    b2 = params["b2"].reshape(2, 1).astype(jnp.float32)
    w3 = params["w3"].astype(jnp.float32)                     # (2, 2)
    b3 = params["b3"].reshape(2, 1).astype(jnp.float32)

    const = lambda i: (0, 0)
    param_specs = [
        pl.BlockSpec(w1.shape, const), pl.BlockSpec(b1.shape, const),
        pl.BlockSpec(w2.shape, const), pl.BlockSpec(b2.shape, const),
        pl.BlockSpec(w3.shape, const), pl.BlockSpec(b3.shape, const),
    ]

    # Streamed activations: triple-buffer on long grids to hide residual DMA
    # latency; the ragged last block (if any) is masked by Pallas.
    if grid >= 3:
        x_spec = pl.BlockSpec((7, tb), lambda i: (0, i),
                              pipeline_mode=pl.Buffered(3))
    else:
        x_spec = pl.BlockSpec((7, tb), lambda i: (0, i))
    out_spec = pl.BlockSpec((2, tb), lambda i: (0, i))

    flops = 2 * B * (7 * 4 + 4 * 2 + 2 * 2)
    bytes_accessed = (B * 7 * x_t.dtype.itemsize + B * 2 * 4
                      + sum(int(p.size) * 4 for p in (w1, b1, w2, b2, w3, b3)))
    cost = pl.CostEstimate(flops=flops, transcendentals=0,
                           bytes_accessed=bytes_accessed)

    out_t = pl.pallas_call(
        _mlp_kernel,
        out_shape=jax.ShapeDtypeStruct((2, B), jnp.float32),
        grid_spec=pl.GridSpec(
            grid=(grid,),
            in_specs=param_specs + [x_spec],
            out_specs=out_spec,
        ),
        compiler_params=pltpu.CompilerParams(
            dimension_semantics=("parallel",),     # shards batch across v7x TCs
            vmem_limit_bytes=VMEM_LIMIT_BYTES,
        ),
        cost_estimate=cost,
    )(w1, b1, w2, b2, w3, b3, x_t)
    return out_t


def net_7_2_forward(x, params, *, block_b=None, stream_dtype=jnp.float32):
    """x: (B, 7) float32. Returns (B, 2) float32, matching Net_7_2.forward.

    The (B,7)->(7,B) transpose happens once on the XLA side so the kernel sees
    a lane-dense feature-major layout. If the producer/consumer can already
    work feature-major, call net_7_2_forward_feature_major directly and skip
    both wrapper transposes (they cost more HBM traffic than the kernel).
    stream_dtype=jnp.bfloat16 nearly halves x's HBM traffic if tolerances allow.
    """
    x_t = jnp.transpose(x).astype(stream_dtype)        # (7, B), batch on lanes
    out_t = net_7_2_forward_feature_major(x_t, params, block_b=block_b)
    return jnp.transpose(out_t)                        # (B, 2)


def init_params(key):
    """Mirrors nn.Linear default init (uniform +/- 1/sqrt(fan_in)).
    Weights stored PyTorch-style as (out, in); biases as (out,)."""
    dims = [(7, 4), (4, 2), (2, 2)]
    params = {}
    for i, (fan_in, fan_out) in enumerate(dims, start=1):
        key, kw, kb = jax.random.split(key, 3)
        bound = 1.0 / jnp.sqrt(fan_in)
        params[f"w{i}"] = jax.random.uniform(
            kw, (fan_out, fan_in), jnp.float32, -bound, bound)
        params[f"b{i}"] = jax.random.uniform(
            kb, (fan_out,), jnp.float32, -bound, bound)
    return params


def reference_forward(x, params):
    h = jnp.maximum(x @ params["w1"].T + params["b1"], 0.0)
    h = jnp.maximum(h @ params["w2"].T + params["b2"], 0.0)
    return h @ params["w3"].T + params["b3"]


if __name__ == "__main__":
    key = jax.random.PRNGKey(0)
    kx, kp = jax.random.split(key)
    params = init_params(kp)

    # 1) Small batch: single full-array block path.
    x_small = jax.random.normal(kx, (8, 7), dtype=jnp.float32)
    out_small = net_7_2_forward(x_small, params)
    jax.block_until_ready(out_small)
    ref_small = reference_forward(x_small, params)
    assert out_small.shape == (8, 2)
    assert jnp.allclose(out_small, ref_small, atol=1e-5, rtol=1e-5)

    # 2) Medium batch, auto tiling: 2 grid steps + ragged last block.
    x_med = jax.random.normal(kx, (1000, 7), dtype=jnp.float32)
    out_med = net_7_2_forward(x_med, params)
    jax.block_until_ready(out_med)
    ref_med = reference_forward(x_med, params)
    assert out_med.shape == (1000, 2)
    assert jnp.allclose(out_med, ref_med, atol=1e-4, rtol=1e-4)

    # 3) Same batch, forced small tiles: long grid exercising pl.Buffered(3)
    #    and the masked partial final tile.
    out_tiled = net_7_2_forward(x_med, params, block_b=128)
    jax.block_until_ready(out_tiled)
    assert jnp.allclose(out_tiled, ref_med, atol=1e-4, rtol=1e-4)

    print("KERNEL_OK")
</pallas_src>

<mosaic_0001>
module attributes {stable_mosaic.version = 11 : i64} {
  func.func @_mlp_kernel(%arg0: i32, %arg1: memref<4x7xf32, #tpu.memory_space<vmem>>, %arg2: memref<4x1xf32, #tpu.memory_space<vmem>>, %arg3: memref<2x4xf32, #tpu.memory_space<vmem>>, %arg4: memref<2x1xf32, #tpu.memory_space<vmem>>, %arg5: memref<2x2xf32, #tpu.memory_space<vmem>>, %arg6: memref<2x1xf32, #tpu.memory_space<vmem>>, %arg7: memref<7x8xf32, #tpu.memory_space<vmem>>, %arg8: memref<2x8xf32, #tpu.memory_space<vmem>>) attributes {dimension_semantics = [#tpu.dimension_semantics<parallel>], iteration_bounds = array<i64: 1>, scalar_prefetch = 0 : i64, scratch_operands = 0 : i64, tpu.core_type = #tpu.core_type<tc>, window_params = [{pipeline_mode = #tpu.pipeline_mode<synchronous>, transform_indices = @transform_0, window_bounds = array<i64: 4, 7>}, {pipeline_mode = #tpu.pipeline_mode<synchronous>, transform_indices = @transform_1, window_bounds = array<i64: 4, 1>}, {pipeline_mode = #tpu.pipeline_mode<synchronous>, transform_indices = @transform_2, window_bounds = array<i64: 2, 4>}, {pipeline_mode = #tpu.pipeline_mode<synchronous>, transform_indices = @transform_3, window_bounds = array<i64: 2, 1>}, {pipeline_mode = #tpu.pipeline_mode<synchronous>, transform_indices = @transform_4, window_bounds = array<i64: 2, 2>}, {pipeline_mode = #tpu.pipeline_mode<synchronous>, transform_indices = @transform_5, window_bounds = array<i64: 2, 1>}, {transform_indices = @transform_6, window_bounds = array<i64: 7, 8>}, {transform_indices = @transform_7, window_bounds = array<i64: 2, 8>}]} {
    %c0 = arith.constant 0 : index
    %c0_0 = arith.constant 0 : index
    %0 = vector.load %arg7[%c0, %c0_0] : memref<7x8xf32, #tpu.memory_space<vmem>>, vector<7x8xf32>
    %c0_1 = arith.constant 0 : index
    %c0_2 = arith.constant 0 : index
    %1 = vector.load %arg1[%c0_1, %c0_2] : memref<4x7xf32, #tpu.memory_space<vmem>>, vector<4x7xf32>
    %cst = arith.constant dense<0.000000e+00> : vector<4x8xf32>
    %2 = tpu.matmul %1, %0, %cst {dimension_numbers = #tpu.dot_dimension_numbers<[1], [0], [0], [1], [0, 0, 1, 1], [], []>} : vector<4x7xf32>, vector<7x8xf32>, vector<4x8xf32> -> vector<4x8xf32>
    %c0_3 = arith.constant 0 : index
    %c0_4 = arith.constant 0 : index
    %3 = vector.load %arg2[%c0_3, %c0_4] : memref<4x1xf32, #tpu.memory_space<vmem>>, vector<4x1xf32>
    %4 = vector.broadcast %3 : vector<4x1xf32> to vector<4x8xf32>
    %5 = arith.addf %2, %4 : vector<4x8xf32>
    %cst_5 = arith.constant 0.000000e+00 : f32
    %6 = vector.broadcast %cst_5 : f32 to vector<4x8xf32>
    %7 = arith.maximumf %5, %6 : vector<4x8xf32>
    %c0_6 = arith.constant 0 : index
    %c0_7 = arith.constant 0 : index
    %8 = vector.load %arg3[%c0_6, %c0_7] : memref<2x4xf32, #tpu.memory_space<vmem>>, vector<2x4xf32>
    %cst_8 = arith.constant dense<0.000000e+00> : vector<2x8xf32>
    %9 = tpu.matmul %8, %7, %cst_8 {dimension_numbers = #tpu.dot_dimension_numbers<[1], [0], [0], [1], [0, 0, 1, 1], [], []>} : vector<2x4xf32>, vector<4x8xf32>, vector<2x8xf32> -> vector<2x8xf32>
    %c0_9 = arith.constant 0 : index
    %c0_10 = arith.constant 0 : index
    %10 = vector.load %arg4[%c0_9, %c0_10] : memref<2x1xf32, #tpu.memory_space<vmem>>, vector<2x1xf32>
    %11 = vector.broadcast %10 : vector<2x1xf32> to vector<2x8xf32>
    %12 = arith.addf %9, %11 : vector<2x8xf32>
    %cst_11 = arith.constant 0.000000e+00 : f32
    %13 = vector.broadcast %cst_11 : f32 to vector<2x8xf32>
    %14 = arith.maximumf %12, %13 : vector<2x8xf32>
    %c0_12 = arith.constant 0 : index
    %c0_13 = arith.constant 0 : index
    %15 = vector.load %arg5[%c0_12, %c0_13] : memref<2x2xf32, #tpu.memory_space<vmem>>, vector<2x2xf32>
    %cst_14 = arith.constant dense<0.000000e+00> : vector<2x8xf32>
    %16 = tpu.matmul %15, %14, %cst_14 {dimension_numbers = #tpu.dot_dimension_numbers<[1], [0], [0], [1], [0, 0, 1, 1], [], []>} : vector<2x2xf32>, vector<2x8xf32>, vector<2x8xf32> -> vector<2x8xf32>
    %c0_15 = arith.constant 0 : index
    %c0_16 = arith.constant 0 : index
    %17 = vector.load %arg6[%c0_15, %c0_16] : memref<2x1xf32, #tpu.memory_space<vmem>>, vector<2x1xf32>
    %18 = vector.broadcast %17 : vector<2x1xf32> to vector<2x8xf32>
    %19 = arith.addf %16, %18 : vector<2x8xf32>
    %c0_17 = arith.constant 0 : index
    %c0_18 = arith.constant 0 : index
    %20 = vector.load %arg8[%c0_17, %c0_18] : memref<2x8xf32, #tpu.memory_space<vmem>>, vector<2x8xf32>
    tpu.vector_store %arg8[%c0_17, %c0_18], %19 {strides = array<i32>} : memref<2x8xf32, #tpu.memory_space<vmem>>, vector<2x8xf32>,
    return
  }
  func.func @transform_0(%arg0: i32) -> (i32, i32) {
    %c0_i32 = arith.constant 0 : i32
    %c0_i32_0 = arith.constant 0 : i32
    %c0_i32_1 = arith.constant 0 : i32
    return %c0_i32, %c0_i32_0 : i32, i32
  }
  func.func @transform_1(%arg0: i32) -> (i32, i32) {
    %c0_i32 = arith.constant 0 : i32
    %c0_i32_0 = arith.constant 0 : i32
    %c0_i32_1 = arith.constant 0 : i32
    return %c0_i32, %c0_i32_0 : i32, i32
  }
  func.func @transform_2(%arg0: i32) -> (i32, i32) {
    %c0_i32 = arith.constant 0 : i32
    %c0_i32_0 = arith.constant 0 : i32
    %c0_i32_1 = arith.constant 0 : i32
    return %c0_i32, %c0_i32_0 : i32, i32
  }
  func.func @transform_3(%arg0: i32) -> (i32, i32) {
    %c0_i32 = arith.constant 0 : i32
    %c0_i32_0 = arith.constant 0 : i32
    %c0_i32_1 = arith.constant 0 : i32
    return %c0_i32, %c0_i32_0 : i32, i32
  }
  func.func @transform_4(%arg0: i32) -> (i32, i32) {
    %c0_i32 = arith.constant 0 : i32
    %c0_i32_0 = arith.constant 0 : i32
    %c0_i32_1 = arith.constant 0 : i32
    return %c0_i32, %c0_i32_0 : i32, i32
  }
  func.func @transform_5(%arg0: i32) -> (i32, i32) {
    %c0_i32 = arith.constant 0 : i32
    %c0_i32_0 = arith.constant 0 : i32
    %c0_i32_1 = arith.constant 0 : i32
    return %c0_i32, %c0_i32_0 : i32, i32
  }
  func.func @transform_6(%arg0: i32) -> (i32, i32) {
    %c0_i32 = arith.constant 0 : i32
    %c0_i32_0 = arith.constant 0 : i32
    return %c0_i32, %arg0 : i32, i32
  }
  func.func @transform_7(%arg0: i32) -> (i32, i32) {
    %c0_i32 = arith.constant 0 : i32
    %c0_i32_0 = arith.constant 0 : i32
    return %c0_i32, %arg0 : i32, i32
  }
}

</mosaic_0001>

<bundles_post_ra>
// kernel: tpu_custom_call.1
= control target key start
LH: loop header
LB: loop body
LE: loop exit
PB: predicated region body
PF: predicated region fallthrough
CT: control target
= control target key end

     0   :  { %12 = vsyncpa [#allocation3], 0  ;;  %s298_s0 = inlined_call_operand.vmem [shape: f32[4,7], index: 0, kind: input, shape index: {}]   ;;  %s299_s1 = inlined_call_operand.vmem [shape: f32[4,1], index: 1, kind: input, shape index: {}]   ;;  %s300_s2 = inlined_call_operand.vmem [shape: f32[2,4], index: 2, kind: input, shape index: {}]   ;;  %s301_s3 = inlined_call_operand.vmem [shape: f32[2,1], index: 3, kind: input, shape index: {}]   ;;  %s302_s4 = inlined_call_operand.vmem [shape: f32[2,2], index: 4, kind: input, shape index: {}]   ;;  %s303_s5 = inlined_call_operand.vmem [shape: f32[2,1], index: 5, kind: input, shape index: {}]   ;;  %s304_s6 = inlined_call_operand.hbm [shape: f32[7,8], index: 6, kind: input, shape index: {}]   ;;  %s305_s7 = inlined_call_operand.hbm [shape: f32[2,8], index: 7, kind: output, shape index: {}]  }
   0x1   :  { %13 = vsyncpa [#allocation4], 0  ;;  %s31_s26 = sshll.u32 %s304_s6, 4  ;;  %s231_s27 = smov [#allocation2]   ;;  %s32_s26 = int_to_ptr.hbm [resolvable:$true] %s31_s26 }
   0x2   :  { %s33_s28 = sshll.u32 %s231_s27, 4  ;;  %s34_s28 = int_to_ptr.vmem [resolvable:$true] %s33_s28 }
   0x3   :  { %36 = dma.hbm_to_vmem [thread:$0]  %s32_s26, 128, %s34_s28, [#allocation3]  }
   0x4   :  { %227 = dma.done.wait [#allocation3], 128  }
   0x5   :  { %228 = vsyncadd [#allocation3], 4294967168  ;;  %v232_v0 = vmov 0   ;;  %vm53_vm0 = vcmask 1046528   ;;  %vm49_vm1 = vcmask 56320   ;;  %vm89_vm2 = vcmask 1043456  }
   0x6   :  { %177 = vset.pattern.permute.xlu0 %v232_v0  ;;  %178 = vset.pattern.permute.xlu1 %v232_v0  ;;  %v41_v1 = vld [vmem:[#allocation2] sm:$0x7f]  ;;  %vm85_vm3 = vcmask 31744   ;;  %vm125_vm4 = vcmask 1041408   ;;  %vm121_vm5 = vcmask 15360   ;;  %vm149_vm6 = vcmask 58368  }
   0x7   :  { %v42_v2 = vld [vmem:[%s298_s0] sm:$0xf]  ;;  %168 = vmatpush.msk.msra.mxu0 %vm53_vm0, %v41_v1 }
   0x8   :  { %v43_v3 = vld [vmem:[%s299_s1] sm:$0xf]  ;;  %169 = vmatmul.msk.f32.vlgmr.msra.gmra.mxu0 %vm49_vm1, %v42_v2 }
   0x9   :  { %46 = vperm.xlu0 %177, %v43_v3   ;;  %v79_v4 = vld [vmem:[%s301_s3] sm:$0x3] }
   0xa   :  { %v78_v9 = vld [vmem:[%s300_s2] sm:$0x3]  ;;  %s233_s2 = smov [#allocation5]  }
   0xb   :  { %v115_v10 = vld [vmem:[%s303_s5] sm:$0x3]  ;;  %s156_s14 = sshll.u32 %s233_s2, 4  ;;  %s158_s5 = sshll.u32 %s305_s7, 4  ;;  %s157_s14 = int_to_ptr.vmem [resolvable:$true] %s156_s14  ;;  %s159_s5 = int_to_ptr.hbm [resolvable:$true] %s158_s5 }
   0xc   :  { %118 = vperm.xlu1 %178, %v115_v10   ;;  %v114_v15 = vld [vmem:[%s302_s4] sm:$0x3] }
  0x11   :  { %82 = vperm.xlu0 %177, %v79_v4  }
  0x7b   :  { %v47_v5 = vpop.permute.xlu0 %46 }
  0x7e   :  { %v119_v16 = vpop.permute.xlu1 %118 }
  0x83   :  { %v83_v11 = vpop.permute.xlu0 %82 }
  0x85   :  { %v74_v6 = vpop.f32.mrf.mxu0 }
  0x86   :  { %v75_v7 = vadd.f32 %v74_v6, %v47_v5 }
  0x88   :  { %v77_v8 = vmax.f32 %v75_v7, 0.0 }
  0x8a   :  { %170 = vmatpush.msk.msra.mxu1 %vm89_vm2, %v77_v8 }
  0x8b   :  { %171 = vmatmul.msk.f32.vlgmr.msra.gmra.mxu1 %vm85_vm3, %v78_v9 }
 0x108   :  { %v110_v12 = vpop.f32.mrf.mxu1 }
 0x109   :  { %v111_v13 = vadd.f32 %v110_v12, %v83_v11 }
 0x10b   :  { %v113_v14 = vmax.f32 %v111_v13, 0.0 }
 0x10d   :  { %172 = vmatpush.msk.msra.mxu2 %vm125_vm4, %v113_v14 }
 0x10e   :  { %173 = vmatmul.msk.f32.vlgmr.msra.gmra.mxu2 %vm121_vm5, %v114_v15 }
 0x191   :  { %v146_v17 = vpop.f32.mrf.mxu2 }
 0x192   :  { %v147_v18 = vadd.f32 %v146_v17, %v119_v16 }
 0x194   :  { %150 = vst.msk [vmem:[#allocation5] sm:$0x3] %vm149_vm6, %v147_v18 }
 0x195   :  { %161 = dma.vmem_to_hbm [thread:$0]  %s157_s14, 32, %s159_s5, [#allocation4]  }
 0x196   :  { %229 = dma.done.wait [#allocation4], 32  }
 0x197   :  { %230 = vsyncadd [#allocation4], 4294967264 }
 0x198   :  { %166 = vsyncpa [#allocation3], 1 }
 0x199   :  { %167 = vsyncpa [#allocation4], 1 }

</bundles_post_ra>
